<compile_context>
chip_gen: v7x
topology: tpu7x:2x2x1
jax: 0.10.0
libtpu: 0.0.40
codegen_flags: <defaults>
</compile_context>

<pallas_src>
import math

import jax
import jax.numpy as jnp
from jax.experimental import pallas as pl
from jax.experimental.pallas import tpu as pltpu

_INV_SQRT2 = 1.0 / math.sqrt(2.0)


def _gelu(h, approximate):
    if approximate:
        # tanh approximation -> transcendental goes to the EUP slot.
        return jax.nn.gelu(h, approximate=True)
    # exact erf GELU: matches torch nn.GELU() default.
    return 0.5 * h * (1.0 + jax.lax.erf(h * _INV_SQRT2))


def _make_mlp_kernel(hid_chunk, n_hid_chunks, approximate):
    def kernel(x_ref, w1_ref, b1_ref, w2_ref, b2_ref, o_ref):
        x = x_ref[...]
        if n_hid_chunks == 1:
            # fc1: native-dtype MXU operands, f32 accumulation; fused bias+GELU.
            h = jnp.dot(x, w1_ref[...], preferred_element_type=jnp.float32)
            h = _gelu(h + b1_ref[...], approximate)
            # fc2: cast the activation back to the weight dtype for the MXU.
            y = jnp.dot(h.astype(w2_ref.dtype), w2_ref[...],
                        preferred_element_type=jnp.float32)
        else:
            # In-kernel D_hid chunking: weights stay whole-resident (read once
            # from HBM); only the f32 hidden intermediate shrinks to
            # (tile_m, hid_chunk).  GELU is elementwise over D_hid, so this is
            # exact.
            y = jnp.zeros(o_ref.shape, jnp.float32)
            for c in range(n_hid_chunks):
                lo = c * hid_chunk
                hi = lo + hid_chunk
                h = jnp.dot(x, w1_ref[:, lo:hi],
                            preferred_element_type=jnp.float32)
                h = _gelu(h + b1_ref[:, lo:hi], approximate)
                y = y + jnp.dot(h.astype(w2_ref.dtype), w2_ref[lo:hi, :],
                                preferred_element_type=jnp.float32)
        # drop1 / drop2 are p=0.0 -> identity.
        o_ref[...] = (y + b2_ref[...]).astype(o_ref.dtype)

    return kernel


def _vmem_capacity_bytes():
    try:
        return int(pltpu.get_tpu_info().vmem_capacity_bytes)
    except Exception:
        return 64 << 20  # conservative fallback (safe on every listed gen)


def _vmem_estimate_bytes(tile_m, D_in, D_hid, D_out, hid_chunk,
                         x_itemsize, w_itemsize):
    # Single-buffered resident weights + f32 biases.
    weights = (D_in * D_hid + D_hid * D_out) * w_itemsize + (D_hid + D_out) * 4
    # Double-buffered x / out row tiles.
    io = 2 * tile_m * (D_in + D_out) * x_itemsize
    # f32 hidden intermediate (per chunk) + its weight-dtype copy + f32 y tile.
    hc = hid_chunk if hid_chunk else D_hid
    tmp = tile_m * hc * (4 + w_itemsize) + tile_m * D_out * 4
    return weights + io + tmp


def _pick_tile_m(rows):
    if rows <= 512:
        return max(8, -(-rows // 8) * 8)  # round up to a sublane multiple
    # Prefer a large MXU-friendly tile that divides rows (no pad, no tail).
    # NOTE(v7x): divisor choice also tends to give an even tile count so both
    # TensorCores get balanced work.
    for cand in (512, 384, 256, 128, 64, 32, 16, 8):
        if rows % cand == 0:
            return cand
    return 512  # rare fallback: ragged rows handled via padding below


def mlp_pallas(x, w1, b1, w2, b2, *, tile_m=None, hid_chunk=None,
               gelu_approximate=False, vmem_limit_bytes=None):
    """x: (..., D_in); w1: (D_in, D_hid); b1: (D_hid,); w2: (D_hid, D_out); b2: (D_out,).

    w1/w2 are the PyTorch nn.Linear weights transposed to (in, out) layout."""
    *lead, D_in = x.shape
    D_hid = w1.shape[1]
    D_out = w2.shape[1]
    rows = math.prod(lead) if lead else 1

    x2 = x.reshape(rows, D_in)

    if tile_m is None:
        tile_m = _pick_tile_m(rows)

    cap = int(0.88 * _vmem_capacity_bytes())  # headroom for Mosaic scratch

    def est(tm, hc):
        return _vmem_estimate_bytes(tm, D_in, D_hid, D_out, hc,
                                    x2.dtype.itemsize, w1.dtype.itemsize)

    # Shrink tile_m, then chunk D_hid, until the working set fits the budget.
    while tile_m > 128 and est(tile_m, hid_chunk) > cap:
        tile_m = max(128, tile_m // 2)
    if hid_chunk is None and est(tile_m, None) > cap:
        for hc in (2048, 1024, 512, 256, 128):
            if D_hid % hc == 0 and est(tile_m, hc) <= cap:
                hid_chunk = hc
                break
    # TODO(synk): if even hid-chunked, single-buffered weights overflow VMEM
    # (e.g. f32 weights with very large D_hid on v7x), cast weights to bf16 in
    # the wrapper or stream K-chunks from HBM with pltpu.emit_pipeline.

    if hid_chunk is not None:
        assert D_hid % hid_chunk == 0, "hid_chunk must divide the hidden dim"
        n_hid_chunks = D_hid // hid_chunk
    else:
        n_hid_chunks = 1

    if vmem_limit_bytes is None:
        vmem_limit_bytes = int(max(min(cap, est(tile_m, hid_chunk) + (8 << 20)),
                                   16 << 20))

    num_tiles = pl.cdiv(rows, tile_m)
    rows_p = num_tiles * tile_m
    if rows_p != rows:
        # Rare fallback (tile_m auto-selection prefers divisors of rows).
        x2 = jnp.pad(x2, ((0, rows_p - rows), (0, 0)))

    # f32 biases resident in VMEM: no per-step astype on resident refs.
    b1_2 = b1.reshape(1, D_hid).astype(jnp.float32)
    b2_2 = b2.reshape(1, D_out).astype(jnp.float32)

    kernel = _make_mlp_kernel(hid_chunk, n_hid_chunks, gelu_approximate)

    def call(single_buffer_weights):
        wmode = ({"pipeline_mode": pl.Buffered(1)}
                 if single_buffer_weights else {})
        grid_spec = pltpu.PrefetchScalarGridSpec(
            num_scalar_prefetch=0,
            grid=(num_tiles,),
            in_specs=[
                pl.BlockSpec((tile_m, D_in), lambda i: (i, 0)),           # x tile
                pl.BlockSpec((D_in, D_hid), lambda i: (0, 0), **wmode),   # W1
                pl.BlockSpec((1, D_hid), lambda i: (0, 0), **wmode),      # b1 (f32)
                pl.BlockSpec((D_hid, D_out), lambda i: (0, 0), **wmode),  # W2
                pl.BlockSpec((1, D_out), lambda i: (0, 0), **wmode),      # b2 (f32)
            ],
            out_specs=pl.BlockSpec((tile_m, D_out), lambda i: (i, 0)),
        )
        return pl.pallas_call(
            kernel,
            out_shape=jax.ShapeDtypeStruct((rows_p, D_out), x.dtype),
            grid_spec=grid_spec,
            compiler_params=pltpu.CompilerParams(
                dimension_semantics=("parallel",),
                vmem_limit_bytes=vmem_limit_bytes),
        )(x2, w1, b1_2, w2, b2_2)

    try:
        # Grid-invariant operands single-buffered (never re-fetched).
        out2 = call(True)
    except Exception:
        # Fallback for JAX versions without BlockSpec(pipeline_mode=...).
        out2 = call(False)

    if rows_p != rows:
        out2 = out2[:rows]
    return out2.reshape(*lead, D_out)


def _mlp_reference(x, w1, b1, w2, b2):
    h = jnp.einsum("bnd,dh->bnh", x, w1) + b1
    h = 0.5 * h * (1.0 + jax.lax.erf(h / jnp.sqrt(2.0)))
    return jnp.einsum("bnh,ho->bno", h, w2) + b2


if __name__ == "__main__":
    # Small shapes consistent with the module's forward: (batch, seq, in_features)
    B, N = 2, 8
    in_features = 32
    hidden_features = 256   # multiple of 128 so the chunked path is exercised
    out_features = in_features  # out_features defaults to in_features

    key = jax.random.PRNGKey(0)
    kx, k1, k2, k3, k4 = jax.random.split(key, 5)

    x = jax.random.normal(kx, (B, N, in_features), dtype=jnp.float32)

    # Deterministic param init (PyTorch Linear weight is (out, in); store transposed).
    bound1 = 1.0 / math.sqrt(in_features)
    w1 = jax.random.uniform(k1, (in_features, hidden_features), jnp.float32, -bound1, bound1)
    b1 = jax.random.uniform(k2, (hidden_features,), jnp.float32, -bound1, bound1)
    bound2 = 1.0 / math.sqrt(hidden_features)
    w2 = jax.random.uniform(k3, (hidden_features, out_features), jnp.float32, -bound2, bound2)
    b2 = jax.random.uniform(k4, (out_features,), jnp.float32, -bound2, bound2)

    y_ref = _mlp_reference(x, w1, b1, w2, b2)

    # 1) Default path: exact erf GELU, auto tile_m divides B*N=16 (no pad copy).
    y = jax.block_until_ready(mlp_pallas(x, w1, b1, w2, b2))
    assert y.shape == (B, N, out_features)
    assert jnp.allclose(y, y_ref, atol=1e-5, rtol=1e-5)

    # 2) In-kernel D_hid chunking path (weights resident, small f32 intermediate).
    y_c = jax.block_until_ready(mlp_pallas(x, w1, b1, w2, b2, hid_chunk=128))
    assert jnp.allclose(y_c, y_ref, atol=1e-5, rtol=1e-5)

    # 3) Tanh-approx GELU (EUP) option: runs and agrees loosely with exact erf.
    y_a = jax.block_until_ready(mlp_pallas(x, w1, b1, w2, b2, gelu_approximate=True))
    assert jnp.allclose(y_a, y_ref, atol=5e-2, rtol=5e-2)

    # 4) bf16 native-dtype path (bf16 operands into the MXU, f32 accumulation).
    y_b = jax.block_until_ready(
        mlp_pallas(x.astype(jnp.bfloat16), w1.astype(jnp.bfloat16),
                   b1.astype(jnp.bfloat16), w2.astype(jnp.bfloat16),
                   b2.astype(jnp.bfloat16)))
    assert y_b.dtype == jnp.bfloat16
    assert jnp.allclose(y_b.astype(jnp.float32), y_ref, atol=0.25, rtol=0.1)

    print("KERNEL_OK")
</pallas_src>

<mosaic_0001>
module attributes {stable_mosaic.version = 11 : i64} {
  func.func @kernel(%arg0: i32, %arg1: memref<16x32xf32, #tpu.memory_space<vmem>>, %arg2: memref<32x256xf32, #tpu.memory_space<vmem>>, %arg3: memref<1x256xf32, #tpu.memory_space<vmem>>, %arg4: memref<256x32xf32, #tpu.memory_space<vmem>>, %arg5: memref<1x32xf32, #tpu.memory_space<vmem>>, %arg6: memref<16x32xf32, #tpu.memory_space<vmem>>) attributes {dimension_semantics = [#tpu.dimension_semantics<parallel>], iteration_bounds = array<i64: 1>, scalar_prefetch = 0 : i64, scratch_operands = 0 : i64, tpu.core_type = #tpu.core_type<tc>, window_params = [{transform_indices = @transform_0, window_bounds = array<i64: 16, 32>}, {pipeline_mode = #tpu.pipeline_mode<synchronous>, transform_indices = @transform_1, window_bounds = array<i64: 32, 256>}, {pipeline_mode = #tpu.pipeline_mode<synchronous>, transform_indices = @transform_2, window_bounds = array<i64: 1, 256>}, {pipeline_mode = #tpu.pipeline_mode<synchronous>, transform_indices = @transform_3, window_bounds = array<i64: 256, 32>}, {pipeline_mode = #tpu.pipeline_mode<synchronous>, transform_indices = @transform_4, window_bounds = array<i64: 1, 32>}, {transform_indices = @transform_5, window_bounds = array<i64: 16, 32>}]} {
    %c0 = arith.constant 0 : index
    %c0_0 = arith.constant 0 : index
    %0 = vector.load %arg1[%c0, %c0_0] : memref<16x32xf32, #tpu.memory_space<vmem>>, vector<16x32xf32>
    %c0_1 = arith.constant 0 : index
    %c0_2 = arith.constant 0 : index
    %1 = vector.load %arg2[%c0_1, %c0_2] : memref<32x256xf32, #tpu.memory_space<vmem>>, vector<32x256xf32>
    %cst = arith.constant dense<0.000000e+00> : vector<16x256xf32>
    %2 = tpu.matmul %0, %1, %cst {dimension_numbers = #tpu.dot_dimension_numbers<[1], [0], [0], [1], [0, 0, 1, 1], [], []>} : vector<16x32xf32>, vector<32x256xf32>, vector<16x256xf32> -> vector<16x256xf32>
    %c0_3 = arith.constant 0 : index
    %c0_4 = arith.constant 0 : index
    %3 = vector.load %arg3[%c0_3, %c0_4] : memref<1x256xf32, #tpu.memory_space<vmem>>, vector<1x256xf32>
    %4 = vector.broadcast %3 : vector<1x256xf32> to vector<16x256xf32>
    %5 = arith.addf %2, %4 : vector<16x256xf32>
    %cst_5 = arith.constant 5.000000e-01 : f32
    %6 = vector.broadcast %cst_5 : f32 to vector<16x256xf32>
    %7 = arith.mulf %6, %5 : vector<16x256xf32>
    %cst_6 = arith.constant 0.707106769 : f32
    %8 = vector.broadcast %cst_6 : f32 to vector<16x256xf32>
    %9 = arith.mulf %5, %8 : vector<16x256xf32>
    %10 = math.erf %9 : vector<16x256xf32>
    %cst_7 = arith.constant 1.000000e+00 : f32
    %11 = vector.broadcast %cst_7 : f32 to vector<16x256xf32>
    %12 = arith.addf %11, %10 : vector<16x256xf32>
    %13 = arith.mulf %7, %12 : vector<16x256xf32>
    %c0_8 = arith.constant 0 : index
    %c0_9 = arith.constant 0 : index
    %14 = vector.load %arg4[%c0_8, %c0_9] : memref<256x32xf32, #tpu.memory_space<vmem>>, vector<256x32xf32>
    %cst_10 = arith.constant dense<0.000000e+00> : vector<16x32xf32>
    %15 = tpu.matmul %13, %14, %cst_10 {dimension_numbers = #tpu.dot_dimension_numbers<[1], [0], [0], [1], [0, 0, 1, 1], [], []>} : vector<16x256xf32>, vector<256x32xf32>, vector<16x32xf32> -> vector<16x32xf32>
    %c0_11 = arith.constant 0 : index
    %c0_12 = arith.constant 0 : index
    %16 = vector.load %arg5[%c0_11, %c0_12] : memref<1x32xf32, #tpu.memory_space<vmem>>, vector<1x32xf32>
    %17 = vector.broadcast %16 : vector<1x32xf32> to vector<16x32xf32>
    %18 = arith.addf %15, %17 : vector<16x32xf32>
    %c0_13 = arith.constant 0 : index
    %c0_14 = arith.constant 0 : index
    %19 = vector.load %arg6[%c0_13, %c0_14] : memref<16x32xf32, #tpu.memory_space<vmem>>, vector<16x32xf32>
    tpu.vector_store %arg6[%c0_13, %c0_14], %18 {strides = array<i32>} : memref<16x32xf32, #tpu.memory_space<vmem>>, vector<16x32xf32>,
    return
  }
  func.func @transform_0(%arg0: i32) -> (i32, i32) {
    %c0_i32 = arith.constant 0 : i32
    %c0_i32_0 = arith.constant 0 : i32
    return %arg0, %c0_i32 : i32, i32
  }
  func.func @transform_1(%arg0: i32) -> (i32, i32) {
    %c0_i32 = arith.constant 0 : i32
    %c0_i32_0 = arith.constant 0 : i32
    %c0_i32_1 = arith.constant 0 : i32
    return %c0_i32, %c0_i32_0 : i32, i32
  }
  func.func @transform_2(%arg0: i32) -> (i32, i32) {
    %c0_i32 = arith.constant 0 : i32
    %c0_i32_0 = arith.constant 0 : i32
    %c0_i32_1 = arith.constant 0 : i32
    return %c0_i32, %c0_i32_0 : i32, i32
  }
  func.func @transform_3(%arg0: i32) -> (i32, i32) {
    %c0_i32 = arith.constant 0 : i32
    %c0_i32_0 = arith.constant 0 : i32
    %c0_i32_1 = arith.constant 0 : i32
    return %c0_i32, %c0_i32_0 : i32, i32
  }
  func.func @transform_4(%arg0: i32) -> (i32, i32) {
    %c0_i32 = arith.constant 0 : i32
    %c0_i32_0 = arith.constant 0 : i32
    %c0_i32_1 = arith.constant 0 : i32
    return %c0_i32, %c0_i32_0 : i32, i32
  }
  func.func @transform_5(%arg0: i32) -> (i32, i32) {
    %c0_i32 = arith.constant 0 : i32
    %c0_i32_0 = arith.constant 0 : i32
    return %arg0, %c0_i32 : i32, i32
  }
}

module attributes {stable_mosaic.version = 11 : i64} {
  func.func @kernel(%arg0: i32, %arg1: memref<16x32xf32, #tpu.memory_space<vmem>>, %arg2: memref<32x256xf32, #tpu.memory_space<vmem>>, %arg3: memref<1x256xf32, #tpu.memory_space<vmem>>, %arg4: memref<256x32xf32, #tpu.memory_space<vmem>>, %arg5: memref<1x32xf32, #tpu.memory_space<vmem>>, %arg6: memref<16x32xf32, #tpu.memory_space<vmem>>) attributes {dimension_semantics = [#tpu.dimension_semantics<parallel>], iteration_bounds = array<i64: 1>, scalar_prefetch = 0 : i64, scratch_operands = 0 : i64, tpu.core_type = #tpu.core_type<tc>, window_params = [{transform_indices = @transform_0, window_bounds = array<i64: 16, 32>}, {pipeline_mode = #tpu.pipeline_mode<synchronous>, transform_indices = @transform_1, window_bounds = array<i64: 32, 256>}, {pipeline_mode = #tpu.pipeline_mode<synchronous>, transform_indices = @transform_2, window_bounds = array<i64: 1, 256>}, {pipeline_mode = #tpu.pipeline_mode<synchronous>, transform_indices = @transform_3, window_bounds = array<i64: 256, 32>}, {pipeline_mode = #tpu.pipeline_mode<synchronous>, transform_indices = @transform_4, window_bounds = array<i64: 1, 32>}, {transform_indices = @transform_5, window_bounds = array<i64: 16, 32>}]} {
    %c0 = arith.constant 0 : index
    %c0_0 = arith.constant 0 : index
    %0 = vector.load %arg1[%c0, %c0_0] : memref<16x32xf32, #tpu.memory_space<vmem>>, vector<16x32xf32>
    %c0_1 = arith.constant 0 : index
    %c0_2 = arith.constant 0 : index
    %1 = vector.load %arg2[%c0_1, %c0_2] : memref<32x256xf32, #tpu.memory_space<vmem>>, vector<32x256xf32>
    %cst = arith.constant dense<0.000000e+00> : vector<16x256xf32>
    %2 = tpu.matmul %0, %1, %cst {dimension_numbers = #tpu.dot_dimension_numbers<[1], [0], [0], [1], [0, 0, 1, 1], [], []>} : vector<16x32xf32>, vector<32x256xf32>, vector<16x256xf32> -> vector<16x256xf32>
    %c0_3 = arith.constant 0 : index
    %c0_4 = arith.constant 0 : index
    %3 = vector.load %arg3[%c0_3, %c0_4] : memref<1x256xf32, #tpu.memory_space<vmem>>, vector<1x256xf32>
    %4 = vector.broadcast %3 : vector<1x256xf32> to vector<16x256xf32>
    %5 = arith.addf %2, %4 : vector<16x256xf32>
    %cst_5 = arith.constant 5.000000e-01 : f32
    %6 = vector.broadcast %cst_5 : f32 to vector<16x256xf32>
    %7 = arith.mulf %6, %5 : vector<16x256xf32>
    %cst_6 = arith.constant 0.707106769 : f32
    %8 = vector.broadcast %cst_6 : f32 to vector<16x256xf32>
    %9 = arith.mulf %5, %8 : vector<16x256xf32>
    %10 = math.erf %9 : vector<16x256xf32>
    %cst_7 = arith.constant 1.000000e+00 : f32
    %11 = vector.broadcast %cst_7 : f32 to vector<16x256xf32>
    %12 = arith.addf %11, %10 : vector<16x256xf32>
    %13 = arith.mulf %7, %12 : vector<16x256xf32>
    %c0_8 = arith.constant 0 : index
    %c0_9 = arith.constant 0 : index
    %14 = vector.load %arg4[%c0_8, %c0_9] : memref<256x32xf32, #tpu.memory_space<vmem>>, vector<256x32xf32>
    %cst_10 = arith.constant dense<0.000000e+00> : vector<16x32xf32>
    %15 = tpu.matmul %13, %14, %cst_10 {dimension_numbers = #tpu.dot_dimension_numbers<[1], [0], [0], [1], [0, 0, 1, 1], [], []>} : vector<16x256xf32>, vector<256x32xf32>, vector<16x32xf32> -> vector<16x32xf32>
    %c0_11 = arith.constant 0 : index
    %c0_12 = arith.constant 0 : index
    %16 = vector.load %arg5[%c0_11, %c0_12] : memref<1x32xf32, #tpu.memory_space<vmem>>, vector<1x32xf32>
    %17 = vector.broadcast %16 : vector<1x32xf32> to vector<16x32xf32>
    %18 = arith.addf %15, %17 : vector<16x32xf32>
    %c0_13 = arith.constant 0 : index
    %c0_14 = arith.constant 0 : index
    %19 = vector.load %arg6[%c0_13, %c0_14] : memref<16x32xf32, #tpu.memory_space<vmem>>, vector<16x32xf32>
    tpu.vector_store %arg6[%c0_13, %c0_14], %18 {strides = array<i32>} : memref<16x32xf32, #tpu.memory_space<vmem>>, vector<16x32xf32>,
    return
  }
  func.func @transform_0(%arg0: i32) -> (i32, i32) {
    %c0_i32 = arith.constant 0 : i32
    %c0_i32_0 = arith.constant 0 : i32
    return %arg0, %c0_i32 : i32, i32
  }
  func.func @transform_1(%arg0: i32) -> (i32, i32) {
    %c0_i32 = arith.constant 0 : i32
    %c0_i32_0 = arith.constant 0 : i32
    %c0_i32_1 = arith.constant 0 : i32
    return %c0_i32, %c0_i32_0 : i32, i32
  }
  func.func @transform_2(%arg0: i32) -> (i32, i32) {
    %c0_i32 = arith.constant 0 : i32
    %c0_i32_0 = arith.constant 0 : i32
    %c0_i32_1 = arith.constant 0 : i32
    return %c0_i32, %c0_i32_0 : i32, i32
  }
  func.func @transform_3(%arg0: i32) -> (i32, i32) {
    %c0_i32 = arith.constant 0 : i32
    %c0_i32_0 = arith.constant 0 : i32
    %c0_i32_1 = arith.constant 0 : i32
    return %c0_i32, %c0_i32_0 : i32, i32
  }
  func.func @transform_4(%arg0: i32) -> (i32, i32) {
    %c0_i32 = arith.constant 0 : i32
    %c0_i32_0 = arith.constant 0 : i32
    %c0_i32_1 = arith.constant 0 : i32
    return %c0_i32, %c0_i32_0 : i32, i32
  }
  func.func @transform_5(%arg0: i32) -> (i32, i32) {
    %c0_i32 = arith.constant 0 : i32
    %c0_i32_0 = arith.constant 0 : i32
    return %arg0, %c0_i32 : i32, i32
  }
}

</mosaic_0001>

<bundles_post_ra>
// kernel: tpu_custom_call.1
= control target key start
LH: loop header
LB: loop body
LE: loop exit
PB: predicated region body
PF: predicated region fallthrough
CT: control target
= control target key end

     0   :  { %v396_v7 = vmov 0.0   ;;  %s578_s0 = inlined_call_operand.vmem [shape: f32[16,32], index: 0, kind: input, shape index: {}]   ;;  %s579_s1 = inlined_call_operand.vmem [shape: f32[32,256], index: 1, kind: input, shape index: {}]   ;;  %s580_s2 = inlined_call_operand.vmem [shape: f32[1,256], index: 2, kind: input, shape index: {}]   ;;  %s581_s3 = inlined_call_operand.vmem [shape: f32[256,32], index: 3, kind: input, shape index: {}]   ;;  %s582_s4 = inlined_call_operand.vmem [shape: f32[1,32], index: 4, kind: input, shape index: {}]   ;;  %s583_s5 = inlined_call_operand.hbm [shape: f32[16,32], index: 5, kind: output, shape index: {}]  }
   0x1   :  { %v24_v0 = vld [vmem:[%s579_s1 + $0x8] sm:$0xff]  ;;  %v26_v1 = vld [vmem:[%s579_s1 + $0x18] sm:$0xff]  ;;  %v23_v2 = vld [vmem:[%s579_s1] sm:$0xff]  ;;  %114 = vmatprep.mubr.f32.mxu0 %v396_v7 }
   0x2   :  { %v320_v3 = vpack.c.bf16 %v26_v1, %v24_v0  ;;  %v25_v4 = vld [vmem:[%s579_s1 + $0x10] sm:$0xff]  ;;  %v28_v5 = vld [vmem:[%s579_s1 + $0x28] sm:$0xff]  ;;  %v30_v6 = vld [vmem:[%s579_s1 + $0x38] sm:$0xff] }
   0x3   :  { %v322_v8 = vpack.c.bf16 %v25_v4, %v23_v2  ;;  %v324_v9 = vpack.c.bf16 %v30_v6, %v28_v5  ;;  %v27_v10 = vld [vmem:[%s579_s1 + $0x20] sm:$0xff]  ;;  %v29_v11 = vld [vmem:[%s579_s1 + $0x30] sm:$0xff]  ;;  %v164_v13 = vld [vmem:[%s581_s3 + $0x88] sm:$0xff] }
   0x4   :  { %321 = vmatprep.subr.bf16.mxu0 %v320_v3  ;;  %v163_v12 = vld [vmem:[%s581_s3 + $0x80] sm:$0xff]  ;;  %v326_v14 = vpack.c.bf16 %v29_v11, %v27_v10  ;;  %v148_v17 = vld [vmem:[%s581_s3 + $0x8] sm:$0xff]  ;;  %v165_v18 = vld [vmem:[%s581_s3 + $0x90] sm:$0xff] }
   0x5   :  { %323 = vmatpush1.bf16.msra.mxu0 %v322_v8  ;;  %v328_v15 = vpack.c.bf16 %v164_v13, %v163_v12  ;;  %v147_v16 = vld [vmem:[%s581_s3] sm:$0xff]  ;;  %v166_v20 = vld [vmem:[%s581_s3 + $0x98] sm:$0xff]  ;;  %v149_v21 = vld [vmem:[%s581_s3 + $0x10] sm:$0xff] }
   0x6   :  { %325 = vmatprep.subr.bf16.mxu0 %v324_v9  ;;  %v330_v19 = vpack.c.bf16 %v148_v17, %v147_v16  ;;  %v150_v22 = vld [vmem:[%s581_s3 + $0x18] sm:$0xff]  ;;  %v332_v23 = vpack.c.bf16 %v166_v20, %v165_v18  ;;  %v167_v24 = vld [vmem:[%s581_s3 + $0xa0] sm:$0xff]  ;;  %v168_v25 = vld [vmem:[%s581_s3 + $0xa8] sm:$0xff] }
   0x7   :  { %329 = vmatprep.subr.bf16.mxu1 %v328_v15  ;;  %v334_v26 = vpack.c.bf16 %v150_v22, %v149_v21 }
   0x8   :  { %331 = vmatpush3.bf16.msra.mxu1 %v330_v19 }
   0x9   :  { %10 = vsyncpa [#allocation3], 0  ;;  %327 = vmatpush1.bf16.msra.mxu0 %v326_v14  ;;  %v21_v27 = vld [vmem:[%s578_s0] sm:$0xff]  ;;  %vm43_vm0 = vcmask 261120   ;;  %333 = vmatprep.subr.bf16.mxu1 %v332_v23  ;;  %v336_v28 = vpack.c.bf16 %v168_v25, %v167_v24  ;;  %v152_v30 = vld [vmem:[%s581_s3 + $0x28] sm:$0xff]  ;;  %v33_v63 = vlaneseq  ;;  %s397_s24 = smov [#allocation2]  }
   0xa   :  { %v151_v29 = vld [vmem:[%s581_s3 + $0x20] sm:$0xff]  ;;  %v22_v32 = vld [vmem:[%s578_s0 + $0x8] sm:$0xff]  ;;  %v169_v33 = vld [vmem:[%s581_s3 + $0xb0] sm:$0xff]  ;;  %s268_s25 = sshll.u32 %s397_s24, 4  ;;  %s269_s25 = int_to_ptr.vmem [resolvable:$true] %s268_s25 }
   0xb   :  { %v338_v31 = vpack.c.bf16 %v152_v30, %v151_v29  ;;  %v170_v34 = vld [vmem:[%s581_s3 + $0xb8] sm:$0xff]  ;;  %v153_v36 = vld [vmem:[%s581_s3 + $0x30] sm:$0xff]  ;;  %v171_v39 = vld [vmem:[%s581_s3 + $0xc0] sm:$0xff]  ;;  %v34_v0 = vshrl.u32 %v33_v63, 7  ;;  %s372_s26 = scalar_lea.vmem %s269_s25, 256  ;;  %p377_p1 = scmp.lt.s32.totalorder %s269_s25, %s269_s25 }
   0xc   :  { %279 = vmatmul.mubr.msk.f32.vlgmr.msra.gmra.mrb[0].mxu0 %vm43_vm0, %v21_v27  ;;  %335 = vmatpush3.bf16.msra.mxu1 %v334_v26  ;;  %v340_v35 = vpack.c.bf16 %v170_v34, %v169_v33  ;;  %v154_v37 = vld [vmem:[%s581_s3 + $0x38] sm:$0xff]  ;;  %v172_v40 = vld [vmem:[%s581_s3 + $0xc8] sm:$0xff]  ;;  %v155_v42 = vld [vmem:[%s581_s3 + $0x40] sm:$0xff]  ;;  %p373_p0 = scmp.ne.s32.totalorder %s269_s25, %s372_s26  ;;  %p378_p2 = scmp.lt.s32.totalorder %s372_s26, %s372_s26 }
   0xd   :  { %120 = vmatprep.mubr.f32.mxu0 %v396_v7  ;;  %337 = vmatprep.subr.bf16.mxu1 %v336_v28  ;;  %v342_v38 = vpack.c.bf16 %v154_v37, %v153_v36  ;;  %v344_v41 = vpack.c.bf16 %v172_v40, %v171_v39  ;;  %v156_v43 = vld [vmem:[%s581_s3 + $0x48] sm:$0xff]  ;;  %v173_v45 = vld [vmem:[%s581_s3 + $0xd0] sm:$0xff]  ;;  %v174_v46 = vld [vmem:[%s581_s3 + $0xd8] sm:$0xff]  ;;  %v35_v1 = vsub.s32 0, %v34_v0  ;;  %v39_v3 = vsub.s32 1, %v34_v0 }
   0xe   :  { %v346_v44 = vpack.c.bf16 %v156_v43, %v155_v42  ;;  %v348_v47 = vpack.c.bf16 %v174_v46, %v173_v45  ;;  %v157_v48 = vld [vmem:[%s581_s3 + $0x50] sm:$0xff]  ;;  %v158_v49 = vld [vmem:[%s581_s3 + $0x58] sm:$0xff]  ;;  %v175_v51 = vld [vmem:[%s581_s3 + $0xe0] sm:$0xff]  ;;  %p379_p3 = por %p378_p2, %p377_p1 }
   0xf   :  { %v350_v50 = vpack.c.bf16 %v158_v49, %v157_v48  ;;  %v176_v52 = vld [vmem:[%s581_s3 + $0xe8] sm:$0xff]  ;;  %v159_v54 = vld [vmem:[%s581_s3 + $0x60] sm:$0xff]  ;;  %v177_v57 = vld [vmem:[%s581_s3 + $0xf0] sm:$0xff] }
  0x10   :  { %280 = vmatmul.mubr.msk.f32.gmra.mrb[2].mxu0 %vm43_vm0, %v22_v32  ;;  %339 = vmatpush3.bf16.msra.mxu1 %v338_v31  ;;  %v352_v53 = vpack.c.bf16 %v176_v52, %v175_v51  ;;  %v160_v55 = vld [vmem:[%s581_s3 + $0x68] sm:$0xff]  ;;  %v178_v58 = vld [vmem:[%s581_s3 + $0xf8] sm:$0xff]  ;;  %v161_v60 = vld [vmem:[%s581_s3 + $0x70] sm:$0xff]  ;;  %p380_p4 = pnand %p379_p3, %p373_p0 }
  0x11   :  { %341 = vmatprep.subr.bf16.mxu1 %v340_v35  ;;  %v354_v56 = vpack.c.bf16 %v160_v55, %v159_v54  ;;  %v356_v59 = vpack.c.bf16 %v178_v58, %v177_v57  ;;  %v162_v61 = vld [vmem:[%s581_s3 + $0x78] sm:$0xff]  ;;  %v31_v2 = vld [vmem:[%s580_s2] sm:$0x3] }
  0x12   :  { %v358_v62 = vpack.c.bf16 %v162_v61, %v161_v60  ;;  %v36_v4 = vrot.slane %v31_v2, %v35_v1  ;;  %v40_v5 = vrot.slane %v31_v2, %v39_v3  ;;  %v281_v35 = vld [vmem:[%s582_s4] ss:$0 sm:$0xff] }
  0x14   :  { %343 = vmatpush3.bf16.msra.mxu1 %v342_v38 }
  0x15   :  { %345 = vmatprep.subr.bf16.mxu1 %v344_v41 }
  0x18   :  { %347 = vmatpush3.bf16.msra.mxu1 %v346_v44 }
  0x19   :  { %349 = vmatprep.subr.bf16.mxu1 %v348_v47 }
  0x1c   :  { %351 = vmatpush3.bf16.msra.mxu1 %v350_v50 }
  0x1d   :  { %353 = vmatprep.subr.bf16.mxu1 %v352_v53 }
  0x20   :  { %355 = vmatpush3.bf16.msra.mxu1 %v354_v56 }
  0x21   :  { %357 = vmatprep.subr.bf16.mxu1 %v356_v59 }
  0x24   :  { %359 = vmatpush3.bf16.msra.mxu1 %v358_v62 }
  0xdf   :  { %v116_v6 = vpop.f32.mrb[0].mxu0 }
  0xe0   :  { %v117_v7 = vadd.f32 %v116_v6, %v36_v4  ;;  %v118_v8 = vpop.f32.mrb[1].mxu0 }
  0xe1   :  { %v119_v9 = vadd.f32 %v118_v8, %v40_v5 }
  0xe2   :  { %v131_v10 = vmul.f32 0.70710677, %v117_v7  ;;  %v127_v23 = vmul.f32 0.5, %v117_v7 }
  0xe3   :  { %v132_v11 = vmul.f32 0.70710677, %v119_v9  ;;  %v122_v12 = vpop.f32.mrb[2].mxu0  ;;  %v128_v21 = vmul.f32 0.5, %v119_v9 }
  0xe4   :  { %364 = verf.f32 %v131_v10  ;;  %v123_v13 = vadd.f32 %v122_v12, %v36_v4  ;;  %v124_v14 = vpop.f32.mrb[3].mxu0 }
  0xe5   :  { %366 = verf.f32 %v132_v11  ;;  %v125_v15 = vadd.f32 %v124_v14, %v40_v5 }
  0xe6   :  { %v133_v16 = vmul.f32 0.70710677, %v123_v13  ;;  %v129_v31 = vmul.f32 0.5, %v123_v13 }
  0xe7   :  { %v134_v17 = vmul.f32 0.70710677, %v125_v15  ;;  %v130_v29 = vmul.f32 0.5, %v125_v15 }
  0xe8   :  { %368 = verf.f32 %v133_v16 }
  0xe9   :  { %370 = verf.f32 %v134_v17 }
  0xee   :  { %v365_v18 = vpop.eup %364 }
  0xef   :  { %v367_v19 = vpop.eup %366  ;;  %v139_v20 = vadd.f32 1.0, %v365_v18 }
  0xf0   :  { %v140_v22 = vadd.f32 1.0, %v367_v19 }
  0xf1   :  { %v143_v28 = vmul.f32 %v139_v20, %v127_v23 }
  0xf2   :  { %v369_v24 = vpop.eup %368  ;;  %v144_v25 = vmul.f32 %v140_v22, %v128_v21 }
  0xf3   :  { %v371_v26 = vpop.eup %370  ;;  %v141_v27 = vadd.f32 1.0, %v369_v24 }
  0xf4   :  { %v142_v30 = vadd.f32 1.0, %v371_v26  ;;  %250 = vmatprep.mubr.f32.mxu1 %v144_v25 }
  0xf5   :  { %251 = vmatmul.mubr.f32.vlgmr.msra.gmra.mrb[0].mxu1 %v143_v28  ;;  %v145_v33 = vmul.f32 %v141_v27, %v129_v31 }
  0xf6   :  { %v146_v32 = vmul.f32 %v142_v30, %v130_v29 }
  0xf8   :  { %255 = vmatprep.mubr.f32.mxu1 %v146_v32 }
  0xf9   :  { %256 = vmatmul.mubr.f32.gmra.mrb[2].mxu1 %v145_v33 }
 0x1c8   :  { %v314_v34 = vpop.f32.mrb[0].mxu1 }
 0x1c9   :  { %v315_v36 = vpop.f32.mrb[1].mxu1 }
 0x1ca   :  { %v316_v37 = vadd.f32 %v315_v36, %v314_v34 }
 0x1cc   :  { %v253_v38 = vadd.f32 %v316_v37, %v281_v35  ;;  %v317_v39 = vpop.f32.mrb[2].mxu1 }
 0x1cd   :  { %v318_v40 = vpop.f32.mrb[3].mxu1 }
 0x1ce   :  { %261 = vst.msk [vmem:[#allocation2] sm:$0xff] %vm43_vm0, %v253_v38  ;;  %v319_v41 = vadd.f32 %v318_v40, %v317_v39 }
 0x1d0   :  { %v258_v42 = vadd.f32 %v319_v41, %v281_v35 }
 0x1d2   :  { %262 = vst.msk [vmem:[#allocation2 + $0x8] sm:$0xff] %vm43_vm0, %v258_v42 }
 0x1d3   :  { %383 = shalt.err (!%p380_p4)
}
 0x1d4   :  { %s384_s28 = scalar_lea.hbm %s583_s5, 256 }
 0x1d5   :  { %p385_p5 = scmp.ne.s32.totalorder %s583_s5, %s384_s28  ;;  %p388_p6 = scmp.lt.u32.totalorder %s384_s28, %s583_s5 }
 0x1d7   :  { %p390_p7 = pnand %p388_p6, %p385_p5 }
 0x1d9   :  { %393 = shalt.err (!%p390_p7)
}
 0x1da   :  { %s398_s8 = smov 128   ;;  %s399_s9 = smov 8  }
 0x1db   :  { %274 = dma.vmem_to_hbm [thread:$0]  %s269_s25, 256, %s583_s5, [#allocation3], %s398_s8, %s398_s8, %s399_s9  }
 0x1dc   :  { %394 = dma.done.wait [#allocation3], 256  }
 0x1dd   :  { %395 = vsyncadd [#allocation3], 4294967040 }
 0x1de   :  { %278 = vsyncpa [#allocation3], 1 }

// kernel: tpu_custom_call.1
= control target key start
LH: loop header
LB: loop body
LE: loop exit
PB: predicated region body
PF: predicated region fallthrough
CT: control target
= control target key end

     0   :  { %v396_v7 = vmov 0.0   ;;  %s578_s0 = inlined_call_operand.vmem [shape: f32[16,32], index: 0, kind: input, shape index: {}]   ;;  %s579_s1 = inlined_call_operand.vmem [shape: f32[32,256], index: 1, kind: input, shape index: {}]   ;;  %s580_s2 = inlined_call_operand.vmem [shape: f32[1,256], index: 2, kind: input, shape index: {}]   ;;  %s581_s3 = inlined_call_operand.vmem [shape: f32[256,32], index: 3, kind: input, shape index: {}]   ;;  %s582_s4 = inlined_call_operand.vmem [shape: f32[1,32], index: 4, kind: input, shape index: {}]   ;;  %s583_s5 = inlined_call_operand.hbm [shape: f32[16,32], index: 5, kind: output, shape index: {}]  }
   0x1   :  { %v24_v0 = vld [vmem:[%s579_s1 + $0x8] sm:$0xff]  ;;  %v26_v1 = vld [vmem:[%s579_s1 + $0x18] sm:$0xff]  ;;  %v23_v2 = vld [vmem:[%s579_s1] sm:$0xff]  ;;  %114 = vmatprep.mubr.f32.mxu0 %v396_v7 }
   0x2   :  { %v320_v3 = vpack.c.bf16 %v26_v1, %v24_v0  ;;  %v25_v4 = vld [vmem:[%s579_s1 + $0x10] sm:$0xff]  ;;  %v28_v5 = vld [vmem:[%s579_s1 + $0x28] sm:$0xff]  ;;  %v30_v6 = vld [vmem:[%s579_s1 + $0x38] sm:$0xff] }
   0x3   :  { %v322_v8 = vpack.c.bf16 %v25_v4, %v23_v2  ;;  %v324_v9 = vpack.c.bf16 %v30_v6, %v28_v5  ;;  %v27_v10 = vld [vmem:[%s579_s1 + $0x20] sm:$0xff]  ;;  %v29_v11 = vld [vmem:[%s579_s1 + $0x30] sm:$0xff]  ;;  %v164_v13 = vld [vmem:[%s581_s3 + $0x88] sm:$0xff] }
   0x4   :  { %321 = vmatprep.subr.bf16.mxu0 %v320_v3  ;;  %v163_v12 = vld [vmem:[%s581_s3 + $0x80] sm:$0xff]  ;;  %v326_v14 = vpack.c.bf16 %v29_v11, %v27_v10  ;;  %v148_v17 = vld [vmem:[%s581_s3 + $0x8] sm:$0xff]  ;;  %v165_v18 = vld [vmem:[%s581_s3 + $0x90] sm:$0xff] }
   0x5   :  { %323 = vmatpush1.bf16.msra.mxu0 %v322_v8  ;;  %v328_v15 = vpack.c.bf16 %v164_v13, %v163_v12  ;;  %v147_v16 = vld [vmem:[%s581_s3] sm:$0xff]  ;;  %v166_v20 = vld [vmem:[%s581_s3 + $0x98] sm:$0xff]  ;;  %v149_v21 = vld [vmem:[%s581_s3 + $0x10] sm:$0xff] }
   0x6   :  { %325 = vmatprep.subr.bf16.mxu0 %v324_v9  ;;  %v330_v19 = vpack.c.bf16 %v148_v17, %v147_v16  ;;  %v150_v22 = vld [vmem:[%s581_s3 + $0x18] sm:$0xff]  ;;  %v332_v23 = vpack.c.bf16 %v166_v20, %v165_v18  ;;  %v167_v24 = vld [vmem:[%s581_s3 + $0xa0] sm:$0xff]  ;;  %v168_v25 = vld [vmem:[%s581_s3 + $0xa8] sm:$0xff] }
   0x7   :  { %329 = vmatprep.subr.bf16.mxu1 %v328_v15  ;;  %v334_v26 = vpack.c.bf16 %v150_v22, %v149_v21 }
   0x8   :  { %331 = vmatpush3.bf16.msra.mxu1 %v330_v19 }
   0x9   :  { %10 = vsyncpa [#allocation3], 0  ;;  %327 = vmatpush1.bf16.msra.mxu0 %v326_v14  ;;  %v21_v27 = vld [vmem:[%s578_s0] sm:$0xff]  ;;  %vm43_vm0 = vcmask 261120   ;;  %333 = vmatprep.subr.bf16.mxu1 %v332_v23  ;;  %v336_v28 = vpack.c.bf16 %v168_v25, %v167_v24  ;;  %v152_v30 = vld [vmem:[%s581_s3 + $0x28] sm:$0xff]  ;;  %v33_v63 = vlaneseq  ;;  %s397_s24 = smov [#allocation2]  }
   0xa   :  { %v151_v29 = vld [vmem:[%s581_s3 + $0x20] sm:$0xff]  ;;  %v22_v32 = vld [vmem:[%s578_s0 + $0x8] sm:$0xff]  ;;  %v169_v33 = vld [vmem:[%s581_s3 + $0xb0] sm:$0xff]  ;;  %s268_s25 = sshll.u32 %s397_s24, 4  ;;  %s269_s25 = int_to_ptr.vmem [resolvable:$true] %s268_s25 }
   0xb   :  { %v338_v31 = vpack.c.bf16 %v152_v30, %v151_v29  ;;  %v170_v34 = vld [vmem:[%s581_s3 + $0xb8] sm:$0xff]  ;;  %v153_v36 = vld [vmem:[%s581_s3 + $0x30] sm:$0xff]  ;;  %v171_v39 = vld [vmem:[%s581_s3 + $0xc0] sm:$0xff]  ;;  %v34_v0 = vshrl.u32 %v33_v63, 7  ;;  %s372_s26 = scalar_lea.vmem %s269_s25, 256  ;;  %p377_p1 = scmp.lt.s32.totalorder %s269_s25, %s269_s25 }
   0xc   :  { %279 = vmatmul.mubr.msk.f32.vlgmr.msra.gmra.mrb[0].mxu0 %vm43_vm0, %v21_v27  ;;  %335 = vmatpush3.bf16.msra.mxu1 %v334_v26  ;;  %v340_v35 = vpack.c.bf16 %v170_v34, %v169_v33  ;;  %v154_v37 = vld [vmem:[%s581_s3 + $0x38] sm:$0xff]  ;;  %v172_v40 = vld [vmem:[%s581_s3 + $0xc8] sm:$0xff]  ;;  %v155_v42 = vld [vmem:[%s581_s3 + $0x40] sm:$0xff]  ;;  %p373_p0 = scmp.ne.s32.totalorder %s269_s25, %s372_s26  ;;  %p378_p2 = scmp.lt.s32.totalorder %s372_s26, %s372_s26 }
   0xd   :  { %120 = vmatprep.mubr.f32.mxu0 %v396_v7  ;;  %337 = vmatprep.subr.bf16.mxu1 %v336_v28  ;;  %v342_v38 = vpack.c.bf16 %v154_v37, %v153_v36  ;;  %v344_v41 = vpack.c.bf16 %v172_v40, %v171_v39  ;;  %v156_v43 = vld [vmem:[%s581_s3 + $0x48] sm:$0xff]  ;;  %v173_v45 = vld [vmem:[%s581_s3 + $0xd0] sm:$0xff]  ;;  %v174_v46 = vld [vmem:[%s581_s3 + $0xd8] sm:$0xff]  ;;  %v35_v1 = vsub.s32 0, %v34_v0  ;;  %v39_v3 = vsub.s32 1, %v34_v0 }
   0xe   :  { %v346_v44 = vpack.c.bf16 %v156_v43, %v155_v42  ;;  %v348_v47 = vpack.c.bf16 %v174_v46, %v173_v45  ;;  %v157_v48 = vld [vmem:[%s581_s3 + $0x50] sm:$0xff]  ;;  %v158_v49 = vld [vmem:[%s581_s3 + $0x58] sm:$0xff]  ;;  %v175_v51 = vld [vmem:[%s581_s3 + $0xe0] sm:$0xff]  ;;  %p379_p3 = por %p378_p2, %p377_p1 }
   0xf   :  { %v350_v50 = vpack.c.bf16 %v158_v49, %v157_v48  ;;  %v176_v52 = vld [vmem:[%s581_s3 + $0xe8] sm:$0xff]  ;;  %v159_v54 = vld [vmem:[%s581_s3 + $0x60] sm:$0xff]  ;;  %v177_v57 = vld [vmem:[%s581_s3 + $0xf0] sm:$0xff] }
  0x10   :  { %280 = vmatmul.mubr.msk.f32.gmra.mrb[2].mxu0 %vm43_vm0, %v22_v32  ;;  %339 = vmatpush3.bf16.msra.mxu1 %v338_v31  ;;  %v352_v53 = vpack.c.bf16 %v176_v52, %v175_v51  ;;  %v160_v55 = vld [vmem:[%s581_s3 + $0x68] sm:$0xff]  ;;  %v178_v58 = vld [vmem:[%s581_s3 + $0xf8] sm:$0xff]  ;;  %v161_v60 = vld [vmem:[%s581_s3 + $0x70] sm:$0xff]  ;;  %p380_p4 = pnand %p379_p3, %p373_p0 }
  0x11   :  { %341 = vmatprep.subr.bf16.mxu1 %v340_v35  ;;  %v354_v56 = vpack.c.bf16 %v160_v55, %v159_v54  ;;  %v356_v59 = vpack.c.bf16 %v178_v58, %v177_v57  ;;  %v162_v61 = vld [vmem:[%s581_s3 + $0x78] sm:$0xff]  ;;  %v31_v2 = vld [vmem:[%s580_s2] sm:$0x3] }
  0x12   :  { %v358_v62 = vpack.c.bf16 %v162_v61, %v161_v60  ;;  %v36_v4 = vrot.slane %v31_v2, %v35_v1  ;;  %v40_v5 = vrot.slane %v31_v2, %v39_v3  ;;  %v281_v35 = vld [vmem:[%s582_s4] ss:$0 sm:$0xff] }
  0x14   :  { %343 = vmatpush3.bf16.msra.mxu1 %v342_v38 }
  0x15   :  { %345 = vmatprep.subr.bf16.mxu1 %v344_v41 }
  0x18   :  { %347 = vmatpush3.bf16.msra.mxu1 %v346_v44 }
  0x19   :  { %349 = vmatprep.subr.bf16.mxu1 %v348_v47 }
  0x1c   :  { %351 = vmatpush3.bf16.msra.mxu1 %v350_v50 }
  0x1d   :  { %353 = vmatprep.subr.bf16.mxu1 %v352_v53 }
  0x20   :  { %355 = vmatpush3.bf16.msra.mxu1 %v354_v56 }
  0x21   :  { %357 = vmatprep.subr.bf16.mxu1 %v356_v59 }
  0x24   :  { %359 = vmatpush3.bf16.msra.mxu1 %v358_v62 }
  0xdf   :  { %v116_v6 = vpop.f32.mrb[0].mxu0 }
  0xe0   :  { %v117_v7 = vadd.f32 %v116_v6, %v36_v4  ;;  %v118_v8 = vpop.f32.mrb[1].mxu0 }
  0xe1   :  { %v119_v9 = vadd.f32 %v118_v8, %v40_v5 }
  0xe2   :  { %v131_v10 = vmul.f32 0.70710677, %v117_v7  ;;  %v127_v23 = vmul.f32 0.5, %v117_v7 }
  0xe3   :  { %v132_v11 = vmul.f32 0.70710677, %v119_v9  ;;  %v122_v12 = vpop.f32.mrb[2].mxu0  ;;  %v128_v21 = vmul.f32 0.5, %v119_v9 }
  0xe4   :  { %364 = verf.f32 %v131_v10  ;;  %v123_v13 = vadd.f32 %v122_v12, %v36_v4  ;;  %v124_v14 = vpop.f32.mrb[3].mxu0 }
  0xe5   :  { %366 = verf.f32 %v132_v11  ;;  %v125_v15 = vadd.f32 %v124_v14, %v40_v5 }
  0xe6   :  { %v133_v16 = vmul.f32 0.70710677, %v123_v13  ;;  %v129_v31 = vmul.f32 0.5, %v123_v13 }
  0xe7   :  { %v134_v17 = vmul.f32 0.70710677, %v125_v15  ;;  %v130_v29 = vmul.f32 0.5, %v125_v15 }
  0xe8   :  { %368 = verf.f32 %v133_v16 }
  0xe9   :  { %370 = verf.f32 %v134_v17 }
  0xee   :  { %v365_v18 = vpop.eup %364 }
  0xef   :  { %v367_v19 = vpop.eup %366  ;;  %v139_v20 = vadd.f32 1.0, %v365_v18 }
  0xf0   :  { %v140_v22 = vadd.f32 1.0, %v367_v19 }
  0xf1   :  { %v143_v28 = vmul.f32 %v139_v20, %v127_v23 }
  0xf2   :  { %v369_v24 = vpop.eup %368  ;;  %v144_v25 = vmul.f32 %v140_v22, %v128_v21 }
  0xf3   :  { %v371_v26 = vpop.eup %370  ;;  %v141_v27 = vadd.f32 1.0, %v369_v24 }
  0xf4   :  { %v142_v30 = vadd.f32 1.0, %v371_v26  ;;  %250 = vmatprep.mubr.f32.mxu1 %v144_v25 }
  0xf5   :  { %251 = vmatmul.mubr.f32.vlgmr.msra.gmra.mrb[0].mxu1 %v143_v28  ;;  %v145_v33 = vmul.f32 %v141_v27, %v129_v31 }
  0xf6   :  { %v146_v32 = vmul.f32 %v142_v30, %v130_v29 }
  0xf8   :  { %255 = vmatprep.mubr.f32.mxu1 %v146_v32 }
  0xf9   :  { %256 = vmatmul.mubr.f32.gmra.mrb[2].mxu1 %v145_v33 }
 0x1c8   :  { %v314_v34 = vpop.f32.mrb[0].mxu1 }
 0x1c9   :  { %v315_v36 = vpop.f32.mrb[1].mxu1 }
 0x1ca   :  { %v316_v37 = vadd.f32 %v315_v36, %v314_v34 }
 0x1cc   :  { %v253_v38 = vadd.f32 %v316_v37, %v281_v35  ;;  %v317_v39 = vpop.f32.mrb[2].mxu1 }
 0x1cd   :  { %v318_v40 = vpop.f32.mrb[3].mxu1 }
 0x1ce   :  { %261 = vst.msk [vmem:[#allocation2] sm:$0xff] %vm43_vm0, %v253_v38  ;;  %v319_v41 = vadd.f32 %v318_v40, %v317_v39 }
 0x1d0   :  { %v258_v42 = vadd.f32 %v319_v41, %v281_v35 }
 0x1d2   :  { %262 = vst.msk [vmem:[#allocation2 + $0x8] sm:$0xff] %vm43_vm0, %v258_v42 }
 0x1d3   :  { %383 = shalt.err (!%p380_p4)
}
 0x1d4   :  { %s384_s28 = scalar_lea.hbm %s583_s5, 256 }
 0x1d5   :  { %p385_p5 = scmp.ne.s32.totalorder %s583_s5, %s384_s28  ;;  %p388_p6 = scmp.lt.u32.totalorder %s384_s28, %s583_s5 }
 0x1d7   :  { %p390_p7 = pnand %p388_p6, %p385_p5 }
 0x1d9   :  { %393 = shalt.err (!%p390_p7)
}
 0x1da   :  { %s398_s8 = smov 128   ;;  %s399_s9 = smov 8  }
 0x1db   :  { %274 = dma.vmem_to_hbm [thread:$0]  %s269_s25, 256, %s583_s5, [#allocation3], %s398_s8, %s398_s8, %s399_s9  }
 0x1dc   :  { %394 = dma.done.wait [#allocation3], 256  }
 0x1dd   :  { %395 = vsyncadd [#allocation3], 4294967040 }
 0x1de   :  { %278 = vsyncpa [#allocation3], 1 }

</bundles_post_ra>
